<compile_context>
chip_gen: v7x
topology: tpu7x:2x2x1
jax: 0.10.0
libtpu: 0.0.40
codegen_flags: <defaults>
</compile_context>

<pallas_src>
from functools import lru_cache

import numpy as np
import jax
import jax.numpy as jnp
from jax.experimental import pallas as pl
from jax.experimental.pallas import tpu as pltpu

POOL = 4  # AvgPool2d(4)


def _lspa_kernel(org_ref, enh_ref, prow_ref, pcol_ref, e_ref):
    f32 = jnp.float32
    tb, hp, wp = e_ref.shape

    prow = prow_ref[...]   # (HP, C*H)  entries 1/(C*POOL): channel mean + row pool
    pcol = pcol_ref[...]   # (W, WP)    entries 1/POOL:     column pool

    # Nearest-neighbour shift matrices, built in-kernel from iota (no operands).
    rw = jax.lax.broadcasted_iota(jnp.int32, (wp, wp), 0)
    cw = jax.lax.broadcasted_iota(jnp.int32, (wp, wp), 1)
    sc = jnp.where(cw == rw + 1, 1.0, 0.0).astype(f32)    # column super-diagonal
    sct = jnp.where(rw == cw + 1, 1.0, 0.0).astype(f32)   # column sub-diagonal
    rh = jax.lax.broadcasted_iota(jnp.int32, (hp, hp), 0)
    ch = jax.lax.broadcasted_iota(jnp.int32, (hp, hp), 1)
    sr = jnp.where(ch == rh + 1, 1.0, 0.0).astype(f32)    # row super-diagonal
    srt = jnp.where(rh == ch + 1, 1.0, 0.0).astype(f32)   # row sub-diagonal

    def dot(a, b):
        return jnp.dot(a, b, preferred_element_type=f32)

    for i in range(tb):                 # static unroll over the images in the block
        # single linear path on the difference (mean/pool/conv are all linear)
        d = org_ref[i].astype(f32) - enh_ref[i].astype(f32)   # (C*H, W)
        p = dot(dot(prow, d), pcol)                           # (HP, WP) pooled diff
        # 3x3 directional diff convs (padding=1) == nearest-neighbour diffs with
        # zero-padded borders; the shift matrices reproduce the border semantics.
        left = p - dot(p, sc)        # p[r, c] - p[r, c-1]
        right = p - dot(p, sct)      # p[r, c] - p[r, c+1]
        up = p - dot(srt, p)         # p[r, c] - p[r-1, c]
        down = p - dot(sr, p)        # p[r, c] - p[r+1, c]
        e_ref[i] = left * left + right * right + up * up + down * down


@lru_cache(maxsize=None)
def _pool_mats(c, h, w):
    """Cached device constants: folded channel-mean+row-pool and column-pool."""
    hp, wp = h // POOL, w // POOL
    prow = np.zeros((hp, c * h), np.float32)
    for p in range(hp):
        for cc in range(c):
            prow[p, cc * h + p * POOL: cc * h + (p + 1) * POOL] = 1.0 / (c * POOL)
    pcol = np.zeros((w, wp), np.float32)
    for q in range(wp):
        pcol[q * POOL:(q + 1) * POOL, q] = 1.0 / POOL
    return jnp.asarray(prow), jnp.asarray(pcol)


def _choose_tb(b, c, h, w, itemsize):
    """Images per grid step: amortize per-step overhead while staying within a
    VMEM budget that is safe on v7x (64 MiB physical), and keep >=2 grid steps
    when possible so both v7x TensorCores get work (no-op on v5e/v6e)."""
    per_image = c * h * w * itemsize
    budget = 3 * 1024 * 1024            # per input array, per pipeline buffer
    tb = int(max(1, min(b, 64, budget // max(per_image, 1))))
    if b >= 4:
        tb = min(tb, b // 2)
    while b % tb:
        tb -= 1
    return tb


def l_spa(org, enhance):
    b, c, h, w = org.shape
    assert enhance.shape == org.shape
    assert h % POOL == 0 and w % POOL == 0
    hp, wp = h // POOL, w // POOL

    tb = _choose_tb(b, c, h, w, int(jnp.dtype(org.dtype).itemsize))
    prow, pcol = _pool_mats(c, h, w)

    # Free wrapper-side reshape so the channel mean folds into the prow matmul.
    org2 = org.reshape(b, c * h, w)
    enh2 = enhance.reshape(b, c * h, w)

    out = pl.pallas_call(
        _lspa_kernel,
        out_shape=jax.ShapeDtypeStruct((b, hp, wp), jnp.float32),
        grid=(b // tb,),
        in_specs=[
            pl.BlockSpec((tb, c * h, w), lambda i: (i, 0, 0)),   # org
            pl.BlockSpec((tb, c * h, w), lambda i: (i, 0, 0)),   # enhance
            pl.BlockSpec((hp, c * h), lambda i: (0, 0)),         # pooling rows (+mean)
            pl.BlockSpec((w, wp), lambda i: (0, 0)),             # pooling cols
        ],
        out_specs=pl.BlockSpec((tb, hp, wp), lambda i: (i, 0, 0)),
        compiler_params=pltpu.CompilerParams(
            dimension_semantics=("parallel",),
            vmem_limit_bytes=32 * 1024 * 1024,
        ),
    )(org2, enh2, prow, pcol)
    return out.reshape(b, 1, hp, wp)


def _lspa_reference(org, enh):
    """Plain-JAX mirror of the PyTorch forward (correctness check)."""
    org_mean = jnp.mean(org, axis=1, keepdims=True)
    enh_mean = jnp.mean(enh, axis=1, keepdims=True)

    def pool4(x):
        bb, cc, hh, ww = x.shape
        return x.reshape(bb, cc, hh // POOL, POOL, ww // POOL, POOL).mean(axis=(3, 5))

    op, ep = pool4(org_mean), pool4(enh_mean)

    def dirs(x):
        xp = jnp.pad(x, ((0, 0), (0, 0), (1, 1), (1, 1)))
        left = x - xp[:, :, 1:-1, 0:-2]
        right = x - xp[:, :, 1:-1, 2:]
        up = x - xp[:, :, 0:-2, 1:-1]
        down = x - xp[:, :, 2:, 1:-1]
        return left, right, up, down

    ol, orr, ou, od = dirs(op)
    el, er, eu, ed = dirs(ep)
    return (ol - el) ** 2 + (orr - er) ** 2 + (ou - eu) ** 2 + (od - ed) ** 2


if __name__ == "__main__":
    B, C, H, W = 4, 4, 16, 16          # small; exercises TB=2 blocking, grid of 2
    key = jax.random.PRNGKey(0)
    k1, k2 = jax.random.split(key)
    org = jax.random.uniform(k1, (B, C, H, W), dtype=jnp.float32)
    enh = jax.random.uniform(k2, (B, C, H, W), dtype=jnp.float32)

    out = jax.block_until_ready(l_spa(org, enh))
    ref = jax.block_until_ready(_lspa_reference(org, enh))

    assert out.shape == (B, 1, H // POOL, W // POOL)
    np.testing.assert_allclose(np.asarray(out), np.asarray(ref),
                               rtol=1e-4, atol=1e-5)
    print("KERNEL_OK")
</pallas_src>

<mosaic_0001>
module attributes {stable_mosaic.version = 11 : i64} {
  func.func @_lspa_kernel(%arg0: i32, %arg1: memref<2x64x16xf32, #tpu.memory_space<vmem>>, %arg2: memref<2x64x16xf32, #tpu.memory_space<vmem>>, %arg3: memref<4x64xf32, #tpu.memory_space<vmem>>, %arg4: memref<16x4xf32, #tpu.memory_space<vmem>>, %arg5: memref<2x4x4xf32, #tpu.memory_space<vmem>>) attributes {dimension_semantics = [#tpu.dimension_semantics<parallel>], iteration_bounds = array<i64: 2>, scalar_prefetch = 0 : i64, scratch_operands = 0 : i64, tpu.core_type = #tpu.core_type<tc>, window_params = [{transform_indices = @transform_0, window_bounds = array<i64: 2, 64, 16>}, {transform_indices = @transform_1, window_bounds = array<i64: 2, 64, 16>}, {pipeline_mode = #tpu.pipeline_mode<synchronous>, transform_indices = @transform_2, window_bounds = array<i64: 4, 64>}, {pipeline_mode = #tpu.pipeline_mode<synchronous>, transform_indices = @transform_3, window_bounds = array<i64: 16, 4>}, {transform_indices = @transform_4, window_bounds = array<i64: 2, 4, 4>}]} {
    %c0 = arith.constant 0 : index
    %c0_0 = arith.constant 0 : index
    %0 = vector.load %arg3[%c0, %c0_0] : memref<4x64xf32, #tpu.memory_space<vmem>>, vector<4x64xf32>
    %c0_1 = arith.constant 0 : index
    %c0_2 = arith.constant 0 : index
    %1 = vector.load %arg4[%c0_1, %c0_2] : memref<16x4xf32, #tpu.memory_space<vmem>>, vector<16x4xf32>
    %2 = tpu.iota {dimensions = array<i32: 0>} : vector<4x4xi32>
    %3 = tpu.iota {dimensions = array<i32: 1>} : vector<4x4xi32>
    %c1_i32 = arith.constant 1 : i32
    %4 = vector.broadcast %c1_i32 : i32 to vector<4x4xi32>
    %5 = arith.addi %2, %4 : vector<4x4xi32>
    %6 = arith.cmpi eq, %3, %5 : vector<4x4xi32>
    %cst = arith.constant 1.000000e+00 : f32
    %cst_3 = arith.constant 0.000000e+00 : f32
    %7 = vector.broadcast %cst : f32 to vector<4x4xf32>
    %8 = vector.broadcast %cst_3 : f32 to vector<4x4xf32>
    %9 = arith.select %6, %7, %8 : vector<4x4xi1>, vector<4x4xf32>
    %c1_i32_4 = arith.constant 1 : i32
    %10 = vector.broadcast %c1_i32_4 : i32 to vector<4x4xi32>
    %11 = arith.addi %3, %10 : vector<4x4xi32>
    %12 = arith.cmpi eq, %2, %11 : vector<4x4xi32>
    %cst_5 = arith.constant 1.000000e+00 : f32
    %cst_6 = arith.constant 0.000000e+00 : f32
    %13 = vector.broadcast %cst_5 : f32 to vector<4x4xf32>
    %14 = vector.broadcast %cst_6 : f32 to vector<4x4xf32>
    %15 = arith.select %12, %13, %14 : vector<4x4xi1>, vector<4x4xf32>
    %16 = tpu.iota {dimensions = array<i32: 0>} : vector<4x4xi32>
    %17 = tpu.iota {dimensions = array<i32: 1>} : vector<4x4xi32>
    %c1_i32_7 = arith.constant 1 : i32
    %18 = vector.broadcast %c1_i32_7 : i32 to vector<4x4xi32>
    %19 = arith.addi %16, %18 : vector<4x4xi32>
    %20 = arith.cmpi eq, %17, %19 : vector<4x4xi32>
    %cst_8 = arith.constant 1.000000e+00 : f32
    %cst_9 = arith.constant 0.000000e+00 : f32
    %21 = vector.broadcast %cst_8 : f32 to vector<4x4xf32>
    %22 = vector.broadcast %cst_9 : f32 to vector<4x4xf32>
    %23 = arith.select %20, %21, %22 : vector<4x4xi1>, vector<4x4xf32>
    %c1_i32_10 = arith.constant 1 : i32
    %24 = vector.broadcast %c1_i32_10 : i32 to vector<4x4xi32>
    %25 = arith.addi %17, %24 : vector<4x4xi32>
    %26 = arith.cmpi eq, %16, %25 : vector<4x4xi32>
    %cst_11 = arith.constant 1.000000e+00 : f32
    %cst_12 = arith.constant 0.000000e+00 : f32
    %27 = vector.broadcast %cst_11 : f32 to vector<4x4xf32>
    %28 = vector.broadcast %cst_12 : f32 to vector<4x4xf32>
    %29 = arith.select %26, %27, %28 : vector<4x4xi1>, vector<4x4xf32>
    %c0_13 = arith.constant 0 : index
    %c0_14 = arith.constant 0 : index
    %c0_15 = arith.constant 0 : index
    %30 = vector.load %arg1[%c0_13, %c0_14, %c0_15] : memref<2x64x16xf32, #tpu.memory_space<vmem>>, vector<1x64x16xf32>
    %31 = vector.shape_cast %30 : vector<1x64x16xf32> to vector<64x16xf32>
    %c0_16 = arith.constant 0 : index
    %c0_17 = arith.constant 0 : index
    %c0_18 = arith.constant 0 : index
    %32 = vector.load %arg2[%c0_16, %c0_17, %c0_18] : memref<2x64x16xf32, #tpu.memory_space<vmem>>, vector<1x64x16xf32>
    %33 = vector.shape_cast %32 : vector<1x64x16xf32> to vector<64x16xf32>
    %34 = arith.subf %31, %33 : vector<64x16xf32>
    %cst_19 = arith.constant dense<0.000000e+00> : vector<4x16xf32>
    %35 = tpu.matmul %0, %34, %cst_19 {dimension_numbers = #tpu.dot_dimension_numbers<[1], [0], [0], [1], [0, 0, 1, 1], [], []>} : vector<4x64xf32>, vector<64x16xf32>, vector<4x16xf32> -> vector<4x16xf32>
    %cst_20 = arith.constant dense<0.000000e+00> : vector<4x4xf32>
    %36 = tpu.matmul %35, %1, %cst_20 {dimension_numbers = #tpu.dot_dimension_numbers<[1], [0], [0], [1], [0, 0, 1, 1], [], []>} : vector<4x16xf32>, vector<16x4xf32>, vector<4x4xf32> -> vector<4x4xf32>
    %cst_21 = arith.constant dense<0.000000e+00> : vector<4x4xf32>
    %37 = tpu.matmul %36, %9, %cst_21 {dimension_numbers = #tpu.dot_dimension_numbers<[1], [0], [0], [1], [0, 0, 1, 1], [], []>} : vector<4x4xf32>, vector<4x4xf32>, vector<4x4xf32> -> vector<4x4xf32>
    %38 = arith.subf %36, %37 : vector<4x4xf32>
    %cst_22 = arith.constant dense<0.000000e+00> : vector<4x4xf32>
    %39 = tpu.matmul %36, %15, %cst_22 {dimension_numbers = #tpu.dot_dimension_numbers<[1], [0], [0], [1], [0, 0, 1, 1], [], []>} : vector<4x4xf32>, vector<4x4xf32>, vector<4x4xf32> -> vector<4x4xf32>
    %40 = arith.subf %36, %39 : vector<4x4xf32>
    %cst_23 = arith.constant dense<0.000000e+00> : vector<4x4xf32>
    %41 = tpu.matmul %29, %36, %cst_23 {dimension_numbers = #tpu.dot_dimension_numbers<[1], [0], [0], [1], [0, 0, 1, 1], [], []>} : vector<4x4xf32>, vector<4x4xf32>, vector<4x4xf32> -> vector<4x4xf32>
    %42 = arith.subf %36, %41 : vector<4x4xf32>
    %cst_24 = arith.constant dense<0.000000e+00> : vector<4x4xf32>
    %43 = tpu.matmul %23, %36, %cst_24 {dimension_numbers = #tpu.dot_dimension_numbers<[1], [0], [0], [1], [0, 0, 1, 1], [], []>} : vector<4x4xf32>, vector<4x4xf32>, vector<4x4xf32> -> vector<4x4xf32>
    %44 = arith.subf %36, %43 : vector<4x4xf32>
    %45 = arith.mulf %38, %38 : vector<4x4xf32>
    %46 = arith.mulf %40, %40 : vector<4x4xf32>
    %47 = arith.addf %45, %46 : vector<4x4xf32>
    %48 = arith.mulf %42, %42 : vector<4x4xf32>
    %49 = arith.addf %47, %48 : vector<4x4xf32>
    %50 = arith.mulf %44, %44 : vector<4x4xf32>
    %51 = arith.addf %49, %50 : vector<4x4xf32>
    %c0_25 = arith.constant 0 : index
    %c0_26 = arith.constant 0 : index
    %c0_27 = arith.constant 0 : index
    %52 = vector.load %arg5[%c0_25, %c0_26, %c0_27] : memref<2x4x4xf32, #tpu.memory_space<vmem>>, vector<1x4x4xf32>
    %53 = vector.shape_cast %52 : vector<1x4x4xf32> to vector<4x4xf32>
    %54 = vector.shape_cast %51 : vector<4x4xf32> to vector<1x4x4xf32>
    tpu.vector_store %arg5[%c0_25, %c0_26, %c0_27], %54 {strides = array<i32>} : memref<2x4x4xf32, #tpu.memory_space<vmem>>, vector<1x4x4xf32>,
    %c1 = arith.constant 1 : index
    %c0_28 = arith.constant 0 : index
    %c0_29 = arith.constant 0 : index
    %55 = vector.load %arg1[%c1, %c0_28, %c0_29] : memref<2x64x16xf32, #tpu.memory_space<vmem>>, vector<1x64x16xf32>
    %56 = vector.shape_cast %55 : vector<1x64x16xf32> to vector<64x16xf32>
    %c1_30 = arith.constant 1 : index
    %c0_31 = arith.constant 0 : index
    %c0_32 = arith.constant 0 : index
    %57 = vector.load %arg2[%c1_30, %c0_31, %c0_32] : memref<2x64x16xf32, #tpu.memory_space<vmem>>, vector<1x64x16xf32>
    %58 = vector.shape_cast %57 : vector<1x64x16xf32> to vector<64x16xf32>
    %59 = arith.subf %56, %58 : vector<64x16xf32>
    %cst_33 = arith.constant dense<0.000000e+00> : vector<4x16xf32>
    %60 = tpu.matmul %0, %59, %cst_33 {dimension_numbers = #tpu.dot_dimension_numbers<[1], [0], [0], [1], [0, 0, 1, 1], [], []>} : vector<4x64xf32>, vector<64x16xf32>, vector<4x16xf32> -> vector<4x16xf32>
    %cst_34 = arith.constant dense<0.000000e+00> : vector<4x4xf32>
    %61 = tpu.matmul %60, %1, %cst_34 {dimension_numbers = #tpu.dot_dimension_numbers<[1], [0], [0], [1], [0, 0, 1, 1], [], []>} : vector<4x16xf32>, vector<16x4xf32>, vector<4x4xf32> -> vector<4x4xf32>
    %cst_35 = arith.constant dense<0.000000e+00> : vector<4x4xf32>
    %62 = tpu.matmul %61, %9, %cst_35 {dimension_numbers = #tpu.dot_dimension_numbers<[1], [0], [0], [1], [0, 0, 1, 1], [], []>} : vector<4x4xf32>, vector<4x4xf32>, vector<4x4xf32> -> vector<4x4xf32>
    %63 = arith.subf %61, %62 : vector<4x4xf32>
    %cst_36 = arith.constant dense<0.000000e+00> : vector<4x4xf32>
    %64 = tpu.matmul %61, %15, %cst_36 {dimension_numbers = #tpu.dot_dimension_numbers<[1], [0], [0], [1], [0, 0, 1, 1], [], []>} : vector<4x4xf32>, vector<4x4xf32>, vector<4x4xf32> -> vector<4x4xf32>
    %65 = arith.subf %61, %64 : vector<4x4xf32>
    %cst_37 = arith.constant dense<0.000000e+00> : vector<4x4xf32>
    %66 = tpu.matmul %29, %61, %cst_37 {dimension_numbers = #tpu.dot_dimension_numbers<[1], [0], [0], [1], [0, 0, 1, 1], [], []>} : vector<4x4xf32>, vector<4x4xf32>, vector<4x4xf32> -> vector<4x4xf32>
    %67 = arith.subf %61, %66 : vector<4x4xf32>
    %cst_38 = arith.constant dense<0.000000e+00> : vector<4x4xf32>
    %68 = tpu.matmul %23, %61, %cst_38 {dimension_numbers = #tpu.dot_dimension_numbers<[1], [0], [0], [1], [0, 0, 1, 1], [], []>} : vector<4x4xf32>, vector<4x4xf32>, vector<4x4xf32> -> vector<4x4xf32>
    %69 = arith.subf %61, %68 : vector<4x4xf32>
    %70 = arith.mulf %63, %63 : vector<4x4xf32>
    %71 = arith.mulf %65, %65 : vector<4x4xf32>
    %72 = arith.addf %70, %71 : vector<4x4xf32>
    %73 = arith.mulf %67, %67 : vector<4x4xf32>
    %74 = arith.addf %72, %73 : vector<4x4xf32>
    %75 = arith.mulf %69, %69 : vector<4x4xf32>
    %76 = arith.addf %74, %75 : vector<4x4xf32>
    %c1_39 = arith.constant 1 : index
    %c0_40 = arith.constant 0 : index
    %c0_41 = arith.constant 0 : index
    %77 = vector.load %arg5[%c1_39, %c0_40, %c0_41] : memref<2x4x4xf32, #tpu.memory_space<vmem>>, vector<1x4x4xf32>
    %78 = vector.shape_cast %77 : vector<1x4x4xf32> to vector<4x4xf32>
    %79 = vector.shape_cast %76 : vector<4x4xf32> to vector<1x4x4xf32>
    tpu.vector_store %arg5[%c1_39, %c0_40, %c0_41], %79 {strides = array<i32>} : memref<2x4x4xf32, #tpu.memory_space<vmem>>, vector<1x4x4xf32>,
    return
  }
  func.func @transform_0(%arg0: i32) -> (i32, i32, i32) {
    %c0_i32 = arith.constant 0 : i32
    %c0_i32_0 = arith.constant 0 : i32
    %c0_i32_1 = arith.constant 0 : i32
    return %arg0, %c0_i32, %c0_i32_0 : i32, i32, i32
  }
  func.func @transform_1(%arg0: i32) -> (i32, i32, i32) {
    %c0_i32 = arith.constant 0 : i32
    %c0_i32_0 = arith.constant 0 : i32
    %c0_i32_1 = arith.constant 0 : i32
    return %arg0, %c0_i32, %c0_i32_0 : i32, i32, i32
  }
  func.func @transform_2(%arg0: i32) -> (i32, i32) {
    %c0_i32 = arith.constant 0 : i32
    %c0_i32_0 = arith.constant 0 : i32
    %c0_i32_1 = arith.constant 0 : i32
    return %c0_i32, %c0_i32_0 : i32, i32
  }
  func.func @transform_3(%arg0: i32) -> (i32, i32) {
    %c0_i32 = arith.constant 0 : i32
    %c0_i32_0 = arith.constant 0 : i32
    %c0_i32_1 = arith.constant 0 : i32
    return %c0_i32, %c0_i32_0 : i32, i32
  }
  func.func @transform_4(%arg0: i32) -> (i32, i32, i32) {
    %c0_i32 = arith.constant 0 : i32
    %c0_i32_0 = arith.constant 0 : i32
    %c0_i32_1 = arith.constant 0 : i32
    return %arg0, %c0_i32, %c0_i32_0 : i32, i32, i32
  }
}

</mosaic_0001>

<bundles_post_ra>
// kernel: tpu_custom_call.1
= control target key start
LH: loop header
LB: loop body
LE: loop exit
PB: predicated region body
PF: predicated region fallthrough
CT: control target
= control target key end

     0   :  { %9 = vsyncpa [#allocation3], 0  ;;  %s1889_s0 = inlined_call_operand.vmem [shape: f32[4,64,16], index: 0, kind: input, shape index: {}]   ;;  %s1890_s1 = inlined_call_operand.vmem [shape: f32[4,64,16], index: 1, kind: input, shape index: {}]   ;;  %s1891_s2 = inlined_call_operand.vmem [shape: f32[4,64], index: 2, kind: input, shape index: {}]   ;;  %s1892_s3 = inlined_call_operand.vmem [shape: f32[16,4], index: 3, kind: input, shape index: {}]   ;;  %s1893_s4 = inlined_call_operand.hbm [shape: f32[4,4,4], index: 4, kind: output, shape index: {}]  }
   0x1   :  { %11 = vsyncpa [#allocation3 + $0x1], 0  ;;  %s1634_s15 = smov 0   ;;  %s1636_s16 = smov 0  }
   0x2   :  { %s1638_s17 = smov 0   ;;  %s1640_s18 = smov 0  }
   0x3 LB: > { %s1655_s19 = sadd.s32 4294967295, %s1601_s18   ;;  %s1277_s20 = sadd.s32 4294967294, %s1601_s18   ;;  %s1601_s18 = sphi %s1640_s18, %s1899_s18   ;;  %s1597_s17 = sphi %s1638_s17, %s1898_s17   ;;  %s1593_s16 = sphi %s1636_s16, %s1897_s16   ;;  %s1589_s15 = sphi %s1634_s15, %s1896_s15  }
   0x4   : > { %s1659_s21 = sadd.s32 1, %s1601_s18   ;;  %s118_s22 = sadd.s32 1, %s1597_s17 }
   0x5   : > { %s115_s23 = ssub.s32 %s1601_s18, %s1659_s21  ;;  %p128_p0 = scmp.ne.s32.totalorder %s1597_s17, %s1593_s16 }
   0x6   : > { %p116_p1 = scmp.eq.s32.totalorder %s115_s23, 0  ;;  %p129_p2 = scmp.eq.s32.totalorder %s1655_s19, 1 }
   0x7   : > { %p134_p3 = scmp.ne.s32.totalorder %s1593_s16, %s1589_s15  ;;  %p135_p4 = scmp.eq.s32.totalorder %s1277_s20, 1 }
   0x8   : > { %s1670_s24 = scalar_select %p116_p1, %s1597_s17, %s118_s22  }
   0x9   : > { %p1672_p5 = por %p129_p2, %p128_p0  ;;  %p1676_p6 = por %p135_p4, %p134_p3 }
   0xa   : > { %p1280_p7 = scmp.ge.s32.totalorder %s1601_s18, 1  ;;  %p179_p8 = scmp.lt.s32.totalorder %s1601_s18, 3 }
   0xc   : > { %p180_p9 = pnand %p1280_p7, %p179_p8 }
   0xd   : > { %s1282_s27 = sshll.u32 (!%p180_p9), %s1655_s19, 1  ;;  %v1603_v0 = vmov (!%p180_p9), 0.0|0.0   ;;  %vm1604_vm0 = vmmov (!%p180_p9), 0   ;;  %v1605_v1 = vmov (!%p180_p9), 0.0   ;;  %v228_v2 = vld [vmem:[%s1892_s3] sm:$0xff] (!%p180_p9)  ;;  %v229_v3 = vld [vmem:[%s1892_s3 + $0x8] sm:$0xff] (!%p180_p9)  ;;  %v230_v34 = vlaneseq (!%p180_p9) }
   0xe   : > { %183 = sbr.rel (%p180_p9) target bundleno = 1160 (0x488), region = 36  ;;  %1465 = vmatprep.subr.bf16.mxu0 (!%p180_p9), %v1603_v0  ;;  %p213_p10 = scmp.lt.s32.totalorder (!%p180_p9), %s1282_s27, 3  ;;  %1389 = vmatprep.mubr.msk.f32.mxu0 (!%p180_p9), %vm1604_vm0, %v1605_v1  ;;  %v1693_v4 = vpack.c.bf16 (!%p180_p9), %v229_v3, %v228_v2  ;;  %v1731_v33 = vld [vmem:[%s1891_s2] sm:$0xf] (!%p180_p9)  ;;  %vm264_vm1 = vcmask (!%p180_p9), 523264   ;;  %vm338_vm3 = vcmask (!%p180_p9), 130048  }
   0xf   : > { %1477 = vmatprep.subr.bf16.mxu1 (!%p180_p9), %v1603_v0  ;;  %1396 = vmatprep.mubr.msk.f32.mxu1 (!%p180_p9), %vm1604_vm0, %v1605_v1  ;;  %v231_v35 = vshrl.u32 (!%p180_p9), %v230_v34, 7  ;;  %v233_v36 = vand.u32 (!%p180_p9), 127, %v230_v34  ;;  %vm416_vm4 = vcmask (!%p180_p9), 1043456   ;;  %vm412_vm6 = vcmask (!%p180_p9), 31744   ;;  %s209_s20 = sand.u32 (!%p180_p9), 1, %s1593_s16   ;;  %s1606_s7 = smov (!%p180_p9), [#allocation2]  }
  0x10   : > { %1479 = vmatpush3.bf16.msra.mxu1 (!%p180_p9), %v1693_v4  ;;  %s1281_s22 = sshll.u32 (!%p180_p9), %s209_s20, 3  ;;  %vm720_vm7 = vcmask (!%p180_p9), 27648   ;;  %s1543_s8 = sshll.u32 (!%p180_p9), %s1606_s7, 4  ;;  %s1544_s8 = int_to_ptr.vmem [resolvable:$false] %s1543_s8 }
  0x11   : > { %1399 = vmatprep.subr.mxu1 (!%p180_p9), %v1605_v1  ;;  %v234_v37 = vadd.s32 (!%p180_p9), 1, %v231_v35  ;;  %v237_v41 = vadd.s32 (!%p180_p9), 1, %v233_v36  ;;  %s1810_s23 = scalar_lea.vmem (!%p180_p9), [#allocation2], %s1281_s22 }
  0x12   : > { %s1203_s28 = sshll.u32 (!%p180_p9), %s1810_s23, 4  ;;  %s1842_s28 = int_to_ptr.vmem [resolvable:$true] %s1203_s28 }
  0x13   : > { %vm235_vm2 = vcmp.eq.s32.totalorder (!%p180_p9), %v233_v36, %v234_v37  ;;  %vm238_vm5 = vcmp.eq.s32.totalorder (!%p180_p9), %v231_v35, %v237_v41  ;;  %p1546_p0 = scmp.lt.s32.totalorder (!%p180_p9), %s1842_s28, %s1544_s8 }
  0x14   : > { %v1739_v38 = vsel (!%p180_p9), %vm235_vm2, 1.0, %v1605_v1  ;;  %v1749_v43 = vsel (!%p180_p9), %vm238_vm5, 1.0, %v1605_v1 }
  0x15   : > { %s1901_s27 = smov (!%p213_p10, %s1282_s27), 3 }
  0x16   : > { %s1330_s6 = sshll.u32 %s1901_s27, 6  ;;  %s1332_s27 = sshll.u32 %s1655_s19, 7 }
  0x17   : > { %s1702_s9 = scalar_lea.vmem %s1889_s0, %s1330_s6  ;;  %s1707_s12 = scalar_lea.vmem %s1890_s1, %s1330_s6 }
  0x18   : > { %v240_v5 = vld [vmem:[%s1702_s9] sm:$0xff]  ;;  %v241_v6 = vld [vmem:[%s1702_s9 + $0x8] sm:$0xff]  ;;  %v242_v10 = vld [vmem:[%s1702_s9 + $0x10] sm:$0xff]  ;;  %s1840_s5 = scalar_lea.hbm %s1893_s4, %s1332_s27  ;;  %s1848_s6 = scalar_lea.sflag [#allocation3], %s209_s20 }
  0x19   : > { %v248_v7 = vld [vmem:[%s1707_s12] sm:$0xff]  ;;  %v249_v8 = vld [vmem:[%s1707_s12 + $0x8] sm:$0xff]  ;;  %v243_v11 = vld [vmem:[%s1702_s9 + $0x18] sm:$0xff]  ;;  %s1539_s19 = scalar_lea.vmem %s1842_s28, 128 }
  0x1a   : > { %v256_v9 = vsub.f32 %v240_v5, %v248_v7  ;;  %v257_v12 = vsub.f32 %v241_v6, %v249_v8  ;;  %v250_v13 = vld [vmem:[%s1707_s12 + $0x10] sm:$0xff]  ;;  %v251_v14 = vld [vmem:[%s1707_s12 + $0x18] sm:$0xff]  ;;  %v244_v15 = vld [vmem:[%s1702_s9 + $0x20] sm:$0xff]  ;;  %p1540_p11 = scmp.ne.s32.totalorder %s1842_s28, %s1539_s19 }
  0x1b   : > { %v258_v16 = vsub.f32 %v242_v10, %v250_v13  ;;  %v259_v17 = vsub.f32 %v243_v11, %v251_v14  ;;  %v245_v18 = vld [vmem:[%s1702_s9 + $0x28] sm:$0xff]  ;;  %v252_v19 = vld [vmem:[%s1707_s12 + $0x20] sm:$0xff]  ;;  %v246_v25 = vld [vmem:[%s1702_s9 + $0x30] sm:$0xff] }
  0x1c   : > { %v253_v20 = vld [vmem:[%s1707_s12 + $0x28] sm:$0xff]  ;;  %v1466_v21 = vpack.c.bf16 %v257_v12, %v256_v9  ;;  %v260_v23 = vsub.f32 %v244_v15, %v252_v19  ;;  %v247_v26 = vld [vmem:[%s1702_s9 + $0x38] sm:$0xff]  ;;  %v254_v27 = vld [vmem:[%s1707_s12 + $0x30] sm:$0xff]  ;;  %p1541_p12 = pnand %p1540_p11, %p1672_p5 }
  0x1d   : > { %v1469_v22 = vpack.c.bf16 %v259_v17, %v258_v16  ;;  %v261_v24 = vsub.f32 %v245_v18, %v253_v20  ;;  %v255_v28 = vld [vmem:[%s1707_s12 + $0x38] sm:$0xff]  ;;  %v262_v30 = vsub.f32 %v246_v25, %v254_v27  ;;  %v1298_v42 = vld [vmem:[%s1702_s9 + $0x40] sm:$0xff]  ;;  %v1299_v44 = vld [vmem:[%s1702_s9 + $0x48] sm:$0xff] }
  0x1e   : > { %1467 = vmatpush3.bf16.msra.mxu0 %v1466_v21  ;;  %v263_v31 = vsub.f32 %v247_v26, %v255_v28  ;;  %v1306_v45 = vld [vmem:[%s1707_s12 + $0x40] sm:$0xff]  ;;  %v1307_v46 = vld [vmem:[%s1707_s12 + $0x48] sm:$0xff]  ;;  %v1300_v51 = vld [vmem:[%s1702_s9 + $0x50] sm:$0xff]  ;;  %p1542_p13 = pneg %p1541_p12 }
  0x1f   : > { %1468 = vmatprep.subr.bf16.mxu0 %v1603_v0  ;;  %v1472_v29 = vpack.c.bf16 %v261_v24, %v260_v23  ;;  %v740_v49 = vsub.f32 %v1298_v42, %v1306_v45  ;;  %v741_v50 = vsub.f32 %v1299_v44, %v1307_v46  ;;  %v1301_v52 = vld [vmem:[%s1702_s9 + $0x58] sm:$0xff]  ;;  %v1308_v53 = vld [vmem:[%s1707_s12 + $0x50] sm:$0xff]  ;;  %v1302_v58 = vld [vmem:[%s1702_s9 + $0x60] sm:$0xff] }
  0x20   : > { %v1475_v32 = vpack.c.bf16 %v263_v31, %v262_v30  ;;  %v1309_v54 = vld [vmem:[%s1707_s12 + $0x58] sm:$0xff]  ;;  %v742_v56 = vsub.f32 %v1300_v51, %v1308_v53  ;;  %v1303_v59 = vld [vmem:[%s1702_s9 + $0x68] sm:$0xff]  ;;  %v1310_v60 = vld [vmem:[%s1707_s12 + $0x60] sm:$0xff] }
  0x21   : > { %v1481_v55 = vpack.c.bf16 %v741_v50, %v740_v49  ;;  %v743_v57 = vsub.f32 %v1301_v52, %v1309_v54  ;;  %v1311_v61 = vld [vmem:[%s1707_s12 + $0x68] sm:$0xff]  ;;  %v744_v63 = vsub.f32 %v1302_v58, %v1310_v60  ;;  %v1304_v3 = vld [vmem:[%s1702_s9 + $0x70] sm:$0xff]  ;;  %v1313_v6 = vld [vmem:[%s1707_s12 + $0x78] sm:$0xff] }
  0x22   : > { %1470 = vmatpush3.bf16.msra.mxu0 %v1469_v22  ;;  %v745_v2 = vsub.f32 %v1303_v59, %v1311_v61  ;;  %v1312_v5 = vld [vmem:[%s1707_s12 + $0x70] sm:$0xff] }
  0x23   : > { %1471 = vmatprep.subr.bf16.mxu0 %v1603_v0  ;;  %v1484_v62 = vpack.c.bf16 %v743_v57, %v742_v56  ;;  %v746_v8 = vsub.f32 %v1304_v3, %v1312_v5 }
  0x24   : > { %v1487_v7 = vpack.c.bf16 %v745_v2, %v744_v63 }
  0x26   : > { %1473 = vmatpush3.bf16.msra.mxu0 %v1472_v29 }
  0x27   : > { %1474 = vmatprep.subr.bf16.mxu0 %v1603_v0 }
  0x2a   : > { %1476 = vmatpush3.bf16.msra.mxu0 %v1475_v32 }
  0x2b   : > { %1414 = vmatprep.subr.mxu0 %v1605_v1 }
  0x2d   : > { %1390 = vmatmul.mubr.msk.f32.vlgmr.msra.gmra.mrb[0].mxu0 %vm264_vm1, %v1731_v33 }
  0x2e   : > { %1416 = vmatprep.mubr.msk.f32.mxu0 %vm1604_vm0, %v1605_v1 }
 0x100   : > { %v334_v39 = vpop.f32.mrb[0].mxu0 }
 0x101   : > { %v1391_v40 = vpop.f32.mrb[1].mxu0  ;;  %1397 = vmatmul.mubr.msk.f32.vlgmr.msra.gmra.mrb[0].mxu1 %vm338_vm3, %v334_v39 }
 0x102   : > { %1400 = vmatpush3.msk.msra.mxu1 %vm416_vm4, %v1739_v38  ;;  %1401 = vmatprep.mubr.msk.f32.mxu1 %vm1604_vm0, %v1605_v1 }
 0x103   : > { %1404 = vmatprep.subr.mxu1 %v1605_v1 }
 0x1d4   : > { %v1754_v47 = vpop.f32.mrb[0].mxu1 }
 0x1d5   : > { %v1398_v48 = vpop.f32.mrb[1].mxu1  ;;  %1402 = vmatmul.mubr.msk.f32.vlgmr.msra.gmra.mrb[2].mxu1 %vm412_vm6, %v1754_v47  ;;  %1415 = vmatpush3.msk.msra.mxu0 %vm416_vm4, %v1754_v47 }
 0x1d6   : > { %1405 = vmatpush3.msk.msra.mxu1 %vm416_vm4, %v1749_v43  ;;  %1417 = vmatmul.mubr.msk.f32.vlgmr.msra.gmra.mrb[2].mxu0 %vm412_vm6, %v1739_v38 }
 0x1d7   : > { %1406 = vmatprep.mubr.msk.f32.mxu1 %vm1604_vm0, %v1605_v1  ;;  %1409 = vmatprep.subr.mxu1 %v1605_v1 }
 0x1d8   : > { %1492 = vmatprep.subr.bf16.mxu0 %v1603_v0  ;;  %1442 = vmatprep.mubr.msk.f32.mxu0 %vm1604_vm0, %v1605_v1 }
 0x1d9   : > { %1407 = vmatmul.mubr.msk.f32.vlgmr.msra.gmra.mrb[4].mxu1 %vm412_vm6, %v1754_v47  ;;  %1494 = vmatpush3.bf16.msra.mxu0 %v1693_v4  ;;  %v1305_v4 = vld [vmem:[%s1702_s9 + $0x78] sm:$0xff]  ;;  %s1545_s9 = scalar_lea.vmem %s1544_s8, 256 }
 0x1da   : > { %1410 = vmatpush3.msk.msra.mxu1 %vm416_vm4, %v1754_v47  ;;  %1411 = vmatprep.mubr.msk.f32.mxu1 %vm1604_vm0, %v1605_v1  ;;  %v747_v9 = vsub.f32 %v1305_v4, %v1313_v6  ;;  %p1547_p1 = scmp.lt.s32.totalorder %s1545_s9, %s1539_s19 }
 0x1db   : > { %1480 = vmatprep.subr.bf16.mxu1 %v1603_v0  ;;  %1445 = vmatprep.subr.mxu0 %v1605_v1 }
 0x1dc   : > { %v1490_v10 = vpack.c.bf16 %v747_v9, %v746_v8  ;;  %p1548_p2 = por %p1547_p1, %p1546_p0 }
 0x1dd   : > { %1412 = vmatmul.mubr.msk.f32.vlgmr.msra.gmra.mrb[6].mxu1 %vm412_vm6, %v1749_v43 }
 0x1de   : > { %1482 = vmatpush3.bf16.msra.mxu1 %v1481_v55  ;;  %1435 = vmatprep.mubr.msk.f32.mxu1 %vm1604_vm0, %v1605_v1  ;;  %p1549_p3 = pnand %p1548_p2, %p1542_p13 }
 0x1df   : > { %1483 = vmatprep.subr.bf16.mxu1 %v1603_v0 }
 0x1e2   : > { %1485 = vmatpush3.bf16.msra.mxu1 %v1484_v62 }
 0x1e3   : > { %1486 = vmatprep.subr.bf16.mxu1 %v1603_v0 }
 0x1e6   : > { %1488 = vmatpush3.bf16.msra.mxu1 %v1487_v7 }
 0x1e7   : > { %1489 = vmatprep.subr.bf16.mxu1 %v1603_v0 }
 0x1ea   : > { %1491 = vmatpush3.bf16.msra.mxu1 %v1490_v10 }
 0x1eb   : > { %1460 = vmatprep.subr.mxu1 %v1605_v1 }
 0x1ed   : > { %1436 = vmatmul.mubr.msk.f32.vlgmr.msra.gmra.mrb[8].mxu1 %vm264_vm1, %v1731_v33 }
 0x1ee   : > { %1462 = vmatprep.mubr.msk.f32.mxu1 %vm1604_vm0, %v1605_v1 }
 0x2a8   : > { %v486_v11 = vpop.f32.mrb[2].mxu1 }
 0x2a9   : > { %v490_v12 = vsub.f32 %v1754_v47, %v486_v11  ;;  %v1403_v13 = vpop.f32.mrb[3].mxu1  ;;  %v708_v14 = vpop.f32.mrb[2].mxu0 }
 0x2aa   : > { %v712_v15 = vsub.f32 %v1754_v47, %v708_v14  ;;  %v1418_v16 = vpop.f32.mrb[3].mxu0 }
 0x2ab   : > { %v713_v19 = vmul.f32 %v490_v12, %v490_v12 }
 0x2ac   : > { %v560_v0 = vpop.f32.mrb[4].mxu1  ;;  %v718_v26 = vmul.f32 %v712_v15, %v712_v15 }
 0x2ad   : > { %v564_v17 = vsub.f32 %v1754_v47, %v560_v0  ;;  %v1408_v18 = vpop.f32.mrb[5].mxu1 }
 0x2af   : > { %v714_v20 = vmul.f32 %v564_v17, %v564_v17 }
 0x2b0   : > { %v635_v21 = vpop.f32.mrb[6].mxu1 }
 0x2b1   : > { %v715_v22 = vadd.f32 %v714_v20, %v713_v19  ;;  %v639_v23 = vsub.f32 %v1754_v47, %v635_v21  ;;  %v1413_v24 = vpop.f32.mrb[7].mxu1 }
 0x2b3   : > { %v716_v25 = vmul.f32 %v639_v23, %v639_v23 }
 0x2b5   : > { %v717_v27 = vadd.f32 %v716_v25, %v715_v22 }
 0x2b7   : > { %v719_v28 = vadd.f32 %v718_v26, %v717_v27 }
 0x2b9   : > { %721 = vst.msk [vmem:[%s1810_s23] sm:$0xf] %vm720_vm7, %v719_v28 }
 0x2c0   : > { %v814_v29 = vpop.f32.mrb[8].mxu1 }
 0x2c1   : > { %v1437_v30 = vpop.f32.mrb[9].mxu1  ;;  %1443 = vmatmul.mubr.msk.f32.vlgmr.msra.gmra.mrb[4].mxu0 %vm338_vm3, %v814_v29 }
 0x2c2   : > { %1446 = vmatpush3.msk.msra.mxu0 %vm416_vm4, %v1739_v38  ;;  %1447 = vmatprep.mubr.msk.f32.mxu0 %vm1604_vm0, %v1605_v1 }
 0x2c3   : > { %1450 = vmatprep.subr.mxu0 %v1605_v1 }
 0x394   : > { %v887_v31 = vpop.f32.mrb[4].mxu0 }
 0x395   : > { %v1444_v32 = vpop.f32.mrb[5].mxu0  ;;  %1448 = vmatmul.mubr.msk.f32.vlgmr.msra.gmra.mrb[6].mxu0 %vm412_vm6, %v887_v31  ;;  %1461 = vmatpush3.msk.msra.mxu1 %vm416_vm4, %v887_v31 }
 0x396   : > { %1451 = vmatpush3.msk.msra.mxu0 %vm416_vm4, %v1749_v43  ;;  %1463 = vmatmul.mubr.msk.f32.vlgmr.msra.gmra.mrb[10].mxu1 %vm412_vm6, %v1739_v38 }
 0x397   : > { %1452 = vmatprep.mubr.msk.f32.mxu0 %vm1604_vm0, %v1605_v1  ;;  %1455 = vmatprep.subr.mxu0 %v1605_v1 }
 0x399   : > { %1453 = vmatmul.mubr.msk.f32.vlgmr.msra.gmra.mrb[8].mxu0 %vm412_vm6, %v887_v31 }
 0x39a   : > { %1456 = vmatpush3.msk.msra.mxu0 %vm416_vm4, %v887_v31  ;;  %1457 = vmatprep.mubr.msk.f32.mxu0 %vm1604_vm0, %v1605_v1 }
 0x39d   : > { %1458 = vmatmul.mubr.msk.f32.vlgmr.msra.gmra.mrb[10].mxu0 %vm412_vm6, %v1749_v43 }
 0x468   : > { %v960_v33 = vpop.f32.mrb[6].mxu0 }
 0x469   : > { %v964_v34 = vsub.f32 %v887_v31, %v960_v33  ;;  %v1449_v35 = vpop.f32.mrb[7].mxu0  ;;  %v1175_v36 = vpop.f32.mrb[10].mxu1 }
 0x46a   : > { %v1179_v37 = vsub.f32 %v887_v31, %v1175_v36  ;;  %v1464_v38 = vpop.f32.mrb[11].mxu1 }
 0x46b   : > { %v1180_v42 = vmul.f32 %v964_v34, %v964_v34 }
 0x46c   : > { %v1031_v39 = vpop.f32.mrb[8].mxu0  ;;  %v1185_v48 = vmul.f32 %v1179_v37, %v1179_v37 }
 0x46d   : > { %v1035_v40 = vsub.f32 %v887_v31, %v1031_v39  ;;  %v1454_v41 = vpop.f32.mrb[9].mxu0 }
 0x46f   : > { %v1181_v44 = vmul.f32 %v1035_v40, %v1035_v40 }
 0x470   : > { %v1104_v45 = vpop.f32.mrb[10].mxu0 }
 0x471   : > { %v1182_v1 = vadd.f32 %v1181_v44, %v1180_v42  ;;  %v1108_v46 = vsub.f32 %v887_v31, %v1104_v45  ;;  %v1459_v43 = vpop.f32.mrb[11].mxu0 }
 0x473   : > { %v1183_v47 = vmul.f32 %v1108_v46, %v1108_v46 }
 0x475   : > { %v1184_v49 = vadd.f32 %v1183_v47, %v1182_v1 }
 0x477   : > { %v1186_v50 = vadd.f32 %v1185_v48, %v1184_v49 }
 0x479   : > { %1324 = vst.msk [vmem:[%s1810_s23 + $0x4] sm:$0xf] %vm720_vm7, %v1186_v50 }
 0x47a   : > { %1552 = shalt.err (!%p1549_p3)
}
 0x47b   : > { %s1553_s10 = scalar_lea.hbm %s1840_s5, 128  ;;  %s1557_s13 = scalar_lea.hbm %s1893_s4, 256 }
 0x47c   : > { %p1554_p4 = scmp.ne.s32.totalorder %s1840_s5, %s1553_s10  ;;  %p1558_p9 = scmp.lt.u32.totalorder %s1840_s5, %s1893_s4 }
 0x47d   : > { %p1559_p10 = scmp.lt.u32.totalorder %s1557_s13, %s1553_s10  ;;  %p1561_p12 = scmp.lt.u32.totalorder %s1553_s10, %s1840_s5 }
 0x47e   : > { %p1555_p7 = pnand %p1554_p4, %p1672_p5 }
 0x47f   : > { %p1560_p11 = por %p1559_p10, %p1558_p9 }
 0x480   : > { %p1556_p8 = pneg %p1555_p7 }
 0x481   : > { %p1562_p13 = por %p1561_p12, %p1560_p11 }
 0x483   : > { %p1563_p0 = pnand %p1562_p13, %p1556_p8 }
 0x485   : > { %1566 = shalt.err (!%p1563_p0)
}
 0x486   : > { %s1607_s22 = smov 64   ;;  %s1608_s23 = smov 4  }
 0x487   : > { %1495 = dma.vmem_to_hbm [thread:$0]  (%p1672_p5), %s1842_s28, 128, %s1840_s5, %s1848_s6, %s1607_s22, %s1607_s22, %s1608_s23  }
 0x488 PF: > { %p1501_p1 = scmp.ge.s32.totalorder %s1601_s18, 2  ;;  %s1218_s27 = sand.u32 1, %s1589_s15  }
 0x489   : > { %s1219_s29 = scalar_lea.sflag [#allocation3], %s1218_s27 }
 0x48a   : > { %p1498_p2 = pnand %p1501_p1, %p1676_p6 }
 0x48c   : > { %1584 = dma.done.wait (!%p1498_p2), %s1219_s29, 128  }
 0x48d   : > { %1586 = vsyncadd (!%p1498_p2), %s1219_s29, 4294967168  ;;  %p14_p3 = scmp.ge.s32.totalorder %s1659_s21, 4   ;;  %s1896_s15 = smov %s1593_s16 }
 0x48e   : > { %s1897_s16 = smov %s1597_s17  ;;  %s1898_s17 = smov %s1670_s24 }
 0x48f   : > { %s1899_s18 = smov %s1659_s21  ;;  %16 = sbr.rel (!%p14_p3) target bundleno = 3 (0x3), region = 77 }
 0x496   :  { %1224 = vsyncpa [#allocation3], 1 }
 0x497   :  { %1226 = vsyncpa [#allocation3 + $0x1], 1 }

</bundles_post_ra>
